<compile_context>
chip_gen: v5e
topology: v5e:2x2
jax: 0.10.0
libtpu: 0.0.40
codegen_flags: <defaults>
</compile_context>

<pallas_src>
import functools

import jax
import jax.numpy as jnp
from jax.experimental import pallas as pl
from jax.experimental.pallas import tpu as pltpu


def _cvi_kernel(x_ref, w_ref, b_ref, o_ref, *, after):
    """One (batch, output-row-tile) grid step.

    x_ref : (1, R, CK)   bf16 im2col patches (R = row_tile * Wo output pixels)
    w_ref : (CK, Cout)   bf16 packed conv weights (resident across the grid)
    b_ref : (1, Cout)    f32 conv bias (zeros when the module has bias=False)
    o_ref : (1, Cout, R) NCHW-flat output slab (channels on sublanes, pixels on lanes)
    """
    patches = x_ref[0]                                       # (R, CK) aligned view, no copy
    acc = jnp.dot(patches, w_ref[...],
                  preferred_element_type=jnp.float32)        # single MXU matmul, f32 acc
    acc = acc + b_ref[...]                                   # (1, Cout) broadcast
    if after == "Tanh":
        acc = jnp.tanh(acc)
    elif after == "sigmoid":
        acc = jax.nn.sigmoid(acc)
    # Transpose the small f32 result on the XLU so the store is lane-dense
    # (R on the lane axis) and no wrapper NCHW relayout pass is needed.
    o_ref[0] = acc.T.astype(o_ref.dtype)


def _pick_row_tile(Ho, Wo, B, bytes_per_row, avail_bytes):
    """Largest layout-friendly row tile within the VMEM budget, keeping >= 2 grid steps."""
    def layout_ok(t):
        # full-height tile is always legal; otherwise keep (t*Wo) a multiple of
        # 128 so both the (rows, CK) input block and the (Cout, rows) output
        # block satisfy the (8, 128) block constraints with dense lanes.
        return t == Ho or (t * Wo) % 128 == 0

    divisors = [t for t in range(1, Ho + 1) if Ho % t == 0 and layout_ok(t)]
    fitting = [t for t in divisors if t * bytes_per_row <= avail_bytes]
    cands = fitting if fitting else [min(divisors)]
    # Prefer tiles that leave at least 2 total grid steps (v7x: 2 TensorCores).
    multi = [t for t in cands if B * (Ho // t) >= 2]
    return max(multi) if multi else max(cands)


def cvi_forward(x, weight, bias=None, *, stride=2, padding=1,
                before=None, after=None, row_tile=None,
                compute_dtype=jnp.bfloat16):
    """Forward pass of Cvi: [before-act] -> Conv2d(K, stride, pad, bias opt) -> [after-act].

    x      : (B, Cin, H, W)     NCHW, like the PyTorch module
    weight : (Cout, Cin, K, K)  PyTorch Conv2d layout
    bias   : (Cout,) or None
    Returns (B, Cout, Ho, Wo) in NCHW.
    """
    B, Cin, H, W = x.shape
    Cout, Cin_w, K, K2 = weight.shape
    assert Cin_w == Cin and K == K2, "groups/dilation != 1 not supported"
    if after == "BN":
        # TODO(synk): BatchNorm2d needs batch/running statistics; eval-mode BN
        # could be folded into a fused (scale, shift) but is not implemented.
        raise NotImplementedError("after='BN' is not supported by the Pallas kernel")
    assert before in (None, "ReLU", "LReLU")
    assert after in (None, "Tanh", "sigmoid")
    assert (H + 2 * padding - K) % stride == 0 and (W + 2 * padding - K) % stride == 0

    Ho = (H + 2 * padding - K) // stride + 1
    Wo = (W + 2 * padding - K) // stride + 1
    CK = K * K * Cin
    out_dtype = x.dtype

    # ---- 'before' activation + bf16 cast, fused by XLA into the single pass
    #      that builds the im2col patches (applied to the original-size x).
    xw = x
    if before == "ReLU":
        xw = jnp.maximum(xw, 0)
    elif before == "LReLU":
        xw = jnp.where(xw >= 0, xw, jnp.asarray(0.1, xw.dtype) * xw)
    xw = xw.astype(compute_dtype)

    # ---- im2col: xk[b, ho*Wo + wo, (kh*K + kw)*Cin + ci] = x_pad[b, ci, s*ho+kh, s*wo+kw]
    xp = jnp.pad(xw, ((0, 0), (0, 0), (padding, padding), (padding, padding)))
    parts = [xp[:, :, kh:kh + stride * Ho:stride, kw:kw + stride * Wo:stride]
             for kh in range(K) for kw in range(K)]            # each (B, Cin, Ho, Wo)
    xk = jnp.stack(parts, axis=1)                               # (B, K*K, Cin, Ho, Wo)
    xk = jnp.transpose(xk, (0, 3, 4, 1, 2)).reshape(B, Ho * Wo, CK)

    # ---- weights: wk[(kh*K + kw)*Cin + ci, co] = weight[co, ci, kh, kw]   (bf16)
    wk = jnp.transpose(weight, (2, 3, 1, 0)).reshape(CK, Cout).astype(compute_dtype)
    b_arr = (bias if bias is not None else jnp.zeros((Cout,), jnp.float32))
    b_arr = b_arr.reshape(1, Cout).astype(jnp.float32)

    # ---- tiling: grid = (batch, output-row tiles), both "parallel".
    try:
        vmem_cap = int(pltpu.get_tpu_info().vmem_capacity_bytes)
    except Exception:
        vmem_cap = 64 * 1024 * 1024        # v7x-sized conservative fallback
    in_item = jnp.dtype(compute_dtype).itemsize
    out_item = jnp.dtype(out_dtype).itemsize
    fixed_bytes = 2 * CK * Cout * in_item + 2 * Cout * 4        # resident weights + bias
    bytes_per_row = Wo * (2 * CK * in_item                      # double-buffered input band
                          + 2 * Cout * out_item                 # double-buffered output band
                          + 2 * Cout * 4)                       # f32 acc + transposed copy
    if row_tile is None:
        budget = max(int(vmem_cap * 0.4) - fixed_bytes, bytes_per_row)
        row_tile = _pick_row_tile(Ho, Wo, B, bytes_per_row, budget)
    assert Ho % row_tile == 0, "row_tile must divide the output height"
    nb = Ho // row_tile
    rows_blk = row_tile * Wo
    assert rows_blk == Ho * Wo or rows_blk % 8 == 0, "row block must be sublane-aligned"

    kernel = functools.partial(_cvi_kernel, after=after)

    out_flat = pl.pallas_call(
        kernel,
        out_shape=jax.ShapeDtypeStruct((B, Cout, Ho * Wo), out_dtype),
        grid_spec=pltpu.PrefetchScalarGridSpec(
            num_scalar_prefetch=0,
            grid=(B, nb),
            in_specs=[
                pl.BlockSpec((1, rows_blk, CK), lambda b, i: (b, i, 0)),
                # constant index maps -> weights / bias stay VMEM-resident
                pl.BlockSpec((CK, Cout), lambda b, i: (0, 0)),
                pl.BlockSpec((1, Cout), lambda b, i: (0, 0)),
            ],
            out_specs=pl.BlockSpec((1, Cout, rows_blk), lambda b, i: (b, 0, i)),
        ),
        compiler_params=pltpu.CompilerParams(
            dimension_semantics=("parallel", "parallel"),
            vmem_limit_bytes=int(min(vmem_cap * 3 // 4, 100 * 1024 * 1024))),
    )(xk, wk, b_arr)

    # (B, Cout, Ho*Wo) -> (B, Cout, Ho, Wo): contiguous split, free (no HBM relayout).
    return out_flat.reshape(B, Cout, Ho, Wo)


def cvi_reference(x, weight, bias=None, *, stride=2, padding=1, before=None, after=None):
    """Pure-JAX/XLA reference matching the PyTorch Cvi forward."""
    if before == "ReLU":
        x = jnp.maximum(x, 0)
    elif before == "LReLU":
        x = jnp.where(x >= 0, x, 0.1 * x)
    y = jax.lax.conv_general_dilated(
        x, weight, window_strides=(stride, stride),
        padding=((padding, padding), (padding, padding)),
        dimension_numbers=("NCHW", "OIHW", "NCHW"))
    if bias is not None:
        y = y + bias[None, :, None, None]
    if after == "Tanh":
        y = jnp.tanh(y)
    elif after == "sigmoid":
        y = jax.nn.sigmoid(y)
    return y


if __name__ == "__main__":
    key = jax.random.PRNGKey(0)
    k1, k2, k3, k4, k5 = jax.random.split(key, 5)

    # Tolerances sized for the bf16 MXU feed (f32 accumulation) vs XLA's
    # default-precision conv; genuine logic errors are O(0.1) and still caught.
    ATOL = RTOL = 1e-2

    # --- Test 1: default Cvi(4, 8) -> plain 4x4 / stride-2 / pad-1 conv, no bias.
    B, Cin, Cout, H, W = 2, 4, 8, 16, 16
    x = jax.random.normal(k1, (B, Cin, H, W), jnp.float32)
    w = 0.02 * jax.random.normal(k2, (Cout, Cin, 4, 4), jnp.float32)  # weights_init('gaussian')
    out = jax.block_until_ready(cvi_forward(x, w))
    ref = jax.block_until_ready(cvi_reference(x, w, None))
    assert out.shape == (B, Cout, H // 2, W // 2)
    assert jnp.allclose(out, ref, atol=ATOL, rtol=RTOL), "Cvi mismatch (plain conv)"

    # --- Test 2: Cvi(3, 16, before='LReLU', after='Tanh', bias=True), larger
    #     spatial size so the output-row grid axis actually tiles (Ho=16, TH=8).
    B2, Ci2, Co2, H2, W2 = 2, 3, 16, 32, 32
    x2 = jax.random.normal(k3, (B2, Ci2, H2, W2), jnp.float32)
    w2 = 0.02 * jax.random.normal(k4, (Co2, Ci2, 4, 4), jnp.float32)
    b2 = 0.1 * jax.random.normal(k5, (Co2,), jnp.float32)  # nonzero: exercises the fused bias
    out2 = jax.block_until_ready(
        cvi_forward(x2, w2, b2, before="LReLU", after="Tanh", row_tile=8))
    ref2 = jax.block_until_ready(
        cvi_reference(x2, w2, b2, before="LReLU", after="Tanh"))
    assert out2.shape == (B2, Co2, H2 // 2, W2 // 2)
    assert jnp.allclose(out2, ref2, atol=ATOL, rtol=RTOL), "Cvi mismatch (LReLU/Tanh/bias)"

    print("KERNEL_OK")
</pallas_src>

<mosaic_0001>
module attributes {stable_mosaic.version = 11 : i64} {
  func.func @_cvi_kernel(%arg0: i32, %arg1: i32, %arg2: memref<1x64x64xbf16, #tpu.memory_space<vmem>>, %arg3: memref<64x8xbf16, #tpu.memory_space<vmem>>, %arg4: memref<1x8xf32, #tpu.memory_space<vmem>>, %arg5: memref<1x8x64xf32, #tpu.memory_space<vmem>>) attributes {dimension_semantics = [#tpu.dimension_semantics<parallel>, #tpu.dimension_semantics<parallel>], iteration_bounds = array<i64: 2, 1>, scalar_prefetch = 0 : i64, scratch_operands = 0 : i64, tpu.core_type = #tpu.core_type<tc>, window_params = [{transform_indices = @transform_0, window_bounds = array<i64: 1, 64, 64>}, {pipeline_mode = #tpu.pipeline_mode<synchronous>, transform_indices = @transform_1, window_bounds = array<i64: 64, 8>}, {pipeline_mode = #tpu.pipeline_mode<synchronous>, transform_indices = @transform_2, window_bounds = array<i64: 1, 8>}, {transform_indices = @transform_3, window_bounds = array<i64: 1, 8, 64>}]} {
    %c0 = arith.constant 0 : index
    %c0_0 = arith.constant 0 : index
    %c0_1 = arith.constant 0 : index
    %0 = vector.load %arg2[%c0, %c0_0, %c0_1] : memref<1x64x64xbf16, #tpu.memory_space<vmem>>, vector<1x64x64xbf16>
    %1 = vector.shape_cast %0 : vector<1x64x64xbf16> to vector<64x64xbf16>
    %c0_2 = arith.constant 0 : index
    %c0_3 = arith.constant 0 : index
    %2 = vector.load %arg3[%c0_2, %c0_3] : memref<64x8xbf16, #tpu.memory_space<vmem>>, vector<64x8xbf16>
    %cst = arith.constant dense<0.000000e+00> : vector<64x8xf32>
    %3 = tpu.matmul %1, %2, %cst {dimension_numbers = #tpu.dot_dimension_numbers<[1], [0], [0], [1], [0, 0, 1, 1], [], []>} : vector<64x64xbf16>, vector<64x8xbf16>, vector<64x8xf32> -> vector<64x8xf32>
    %c0_4 = arith.constant 0 : index
    %c0_5 = arith.constant 0 : index
    %4 = vector.load %arg4[%c0_4, %c0_5] : memref<1x8xf32, #tpu.memory_space<vmem>>, vector<1x8xf32>
    %5 = vector.broadcast %4 : vector<1x8xf32> to vector<64x8xf32>
    %6 = arith.addf %3, %5 : vector<64x8xf32>
    %7 = tpu.transpose %6, [1, 0] : vector<64x8xf32> -> vector<8x64xf32>
    %c0_6 = arith.constant 0 : index
    %c0_7 = arith.constant 0 : index
    %c0_8 = arith.constant 0 : index
    %8 = vector.load %arg5[%c0_6, %c0_7, %c0_8] : memref<1x8x64xf32, #tpu.memory_space<vmem>>, vector<1x8x64xf32>
    %9 = vector.shape_cast %8 : vector<1x8x64xf32> to vector<8x64xf32>
    %10 = vector.shape_cast %7 : vector<8x64xf32> to vector<1x8x64xf32>
    tpu.vector_store %arg5[%c0_6, %c0_7, %c0_8], %10 {strides = array<i32>} : memref<1x8x64xf32, #tpu.memory_space<vmem>>, vector<1x8x64xf32>,
    return
  }
  func.func @transform_0(%arg0: i32, %arg1: i32) -> (i32, i32, i32) {
    %c0_i32 = arith.constant 0 : i32
    %c0_i32_0 = arith.constant 0 : i32
    return %arg0, %arg1, %c0_i32 : i32, i32, i32
  }
  func.func @transform_1(%arg0: i32, %arg1: i32) -> (i32, i32) {
    %c0_i32 = arith.constant 0 : i32
    %c0_i32_0 = arith.constant 0 : i32
    %c0_i32_1 = arith.constant 0 : i32
    return %c0_i32, %c0_i32_0 : i32, i32
  }
  func.func @transform_2(%arg0: i32, %arg1: i32) -> (i32, i32) {
    %c0_i32 = arith.constant 0 : i32
    %c0_i32_0 = arith.constant 0 : i32
    %c0_i32_1 = arith.constant 0 : i32
    return %c0_i32, %c0_i32_0 : i32, i32
  }
  func.func @transform_3(%arg0: i32, %arg1: i32) -> (i32, i32, i32) {
    %c0_i32 = arith.constant 0 : i32
    %c0_i32_0 = arith.constant 0 : i32
    return %arg0, %c0_i32, %arg1 : i32, i32, i32
  }
}

</mosaic_0001>

<bundles_post_ra>
// kernel: tpu_custom_call.1
= control target key start
LH: loop header
LB: loop body
LE: loop exit
PB: predicated region body
PF: predicated region fallthrough
CT: control target
= control target key end

     0   :  { %8 = vsyncpa [#allocation3], 0  ;;  %s863_s0 = inlined_call_operand.hbm [shape: bf16[2,64,64], index: 0, kind: input, shape index: {}]   ;;  %s864_s1 = inlined_call_operand.vmem [shape: bf16[64,8], index: 1, kind: input, shape index: {}]   ;;  %s865_s2 = inlined_call_operand.vmem [shape: f32[1,8], index: 2, kind: input, shape index: {}]   ;;  %s866_s3 = inlined_call_operand.hbm [shape: f32[2,8,64], index: 3, kind: output, shape index: {}]  }
   0x1   :  { %10 = vsyncpa [#allocation3 + $0x1], 0 }
   0x2   :  { %11 = vsyncpa [#allocation4], 0 }
   0x3   :  { %13 = vsyncpa [#allocation4 + $0x1], 0  ;;  %s722_s12 = smov 0   ;;  %s724_s13 = smov 0  }
   0x4   :  { %s726_s14 = smov 0   ;;  %s728_s15 = smov 0  }
   0x5   :  { %s730_s16 = smov 0   ;;  %s732_s17 = smov 0  }
   0x6 LB: > { %s449_s18 = sadd.s32 4294967295, %s698_s17   ;;  %s450_s19 = sadd.s32 4294967294, %s698_s17   ;;  %s698_s17 = sphi %s732_s17, %s19_s17   ;;  %s694_s16 = sphi %s730_s16, %s875_s16   ;;  %s690_s15 = sphi %s728_s15, %s874_s15   ;;  %s686_s14 = sphi %s726_s14, %s873_s14   ;;  %s682_s13 = sphi %s724_s13, %s872_s13   ;;  %s678_s12 = sphi %s722_s12, %s871_s12  }
   0x7   : > { %s31_s20 = sadd.s32 1, %s694_s16  ;;  %s40_s21 = sadd.s32 1, %s686_s14 }
   0x8   : > { %p33_p0 = scmp.ge.s32.totalorder %s31_s20, 2  ;;  %p47_p1 = scmp.ne.s32.totalorder %s686_s14, %s682_s13 }
   0x9   : > { %p48_p2 = scmp.eq.s32.totalorder %s698_s17, 0  ;;  %p53_p3 = scmp.ne.s32.totalorder %s682_s13, %s678_s12 }
   0xa   : > { %s877_s20 = smov (%p33_p0, %s31_s20), 0  ;;  %p54_p5 = scmp.eq.s32.totalorder %s449_s18, 0 }
   0xb   : > { %p763_p4 = por %p48_p2, %p47_p1  ;;  %s35_s23 = ssub.s32 %s694_s16, %s877_s20 }
   0xc   : > { %p121_p6 = scmp.eq.s32.totalorder %s449_s18, 1  ;;  %p38_p7 = scmp.eq.s32.totalorder %s35_s23, 0 }
   0xd   : > { %p769_p8 = por %p54_p5, %p53_p3  ;;  %p127_p10 = scmp.eq.s32.totalorder %s450_s19, 1 }
   0xe   : > { %p773_p9 = por %p121_p6, %p47_p1  ;;  %p452_p12 = scmp.ge.s32.totalorder %s698_s17, 2 }
   0xf   : > { %s778_s26 = scalar_select %p38_p7, %s686_s14, %s40_s21  }
  0x10   : > { %p780_p11 = por %p127_p10, %p53_p3  ;;  %p532_p13 = scmp.lt.s32.totalorder %s698_s17, 2 }
  0x11   : > { %s153_s28 = sand.u32 1, %s686_s14   ;;  %s499_s30 = sshll.u32 %s694_s16, 5 }
  0x12   : > { %s453_s29 = sshll.u32 %s153_s28, 5  ;;  %s164_s6 = scalar_lea.hbm %s863_s0, %s499_s30 }
  0x13   : > { %s157_s7 = scalar_lea.vmem [#allocation2], %s453_s29  ;;  %s165_s9 = sshll.u32 %s164_s6, 4  ;;  %s166_s9 = int_to_ptr.hbm [resolvable:$true] %s165_s9 }
  0x14   : > { %s167_s8 = sshll.u32 %s157_s7, 4  ;;  %p525_p0 = pnand %p532_p13, %p763_p4  ;;  %s168_s8 = int_to_ptr.vmem [resolvable:$true] %s167_s8 }
  0x15   : > { %p456_p1 = scmp.ge.s32.totalorder %s698_s17, 1  ;;  %s154_s10 = scalar_lea.sflag [#allocation3], %s153_s28 }
  0x16   : > { %s700_s11 = smov 64   ;;  %s701_s18 = smov 4  }
  0x17   : > { %527 = dma.hbm_to_vmem [thread:$0]  (!%p525_p0), %s166_s9, 512, %s168_s8, %s154_s10, %s700_s11, %s700_s11, %s701_s18  }
  0x18   : > { %p175_p2 = scmp.lt.s32.totalorder %s698_s17, 3 }
  0x1a   : > { %p176_p3 = pnand %p456_p1, %p175_p2 }
  0x1b   : > { %s796_s19 = sand.u32 (!%p176_p3), 1, %s682_s13  }
  0x1c   : > { %179 = sbr.rel (%p176_p3) target bundleno = 346 (0x15a), region = 32  ;;  %s457_s21 = sshll.u32 (!%p176_p3), %s796_s19, 5 }
  0x1d   : > { %s182_s23 = scalar_lea.sflag (!%p176_p3), [#allocation3], %s796_s19  ;;  %s185_s29 = scalar_lea.vmem (!%p176_p3), [#allocation2], %s457_s21 }
  0x21   : > { %669 = dma.done.wait (%p769_p8), %s182_s23, 512  }
  0x22   : > { %671 = vsyncadd (%p769_p8), %s182_s23, 4294966784  ;;  %v507_v0 = vld [vmem:[%s864_s1 + $0x18] sm:$0xff]  ;;  %v506_v1 = vld [vmem:[%s864_s1 + $0x10] sm:$0xff]  ;;  %vm275_vm0 = vcmask 523264   ;;  %s458_s10 = sshll.u32 %s796_s19, 3  ;;  %s496_s11 = sshll.u32 %s690_s15, 3 }
  0x23   : > { %292 = vmatpush.bf16.msra.mxu0 %v507_v0  ;;  %508 = vmatpush.bf16.msra.mxu1 %v507_v0  ;;  %v505_v2 = vld [vmem:[%s864_s1 + $0x8] sm:$0xff]  ;;  %v504_v3 = vld [vmem:[%s864_s1] sm:$0xff]  ;;  %v502_v6 = vld [vmem:[%s185_s29 + $0x10] sm:$0xff]  ;;  %s362_s23 = scalar_lea.hbm %s866_s3, %s496_s11  ;;  %s351_s30 = scalar_lea.sflag [#allocation4], %s796_s19 }
  0x24   : > { %509 = vmatpush.bf16.msra.mxu2 %v507_v0  ;;  %510 = vmatpush.bf16.msra.mxu3 %v507_v0  ;;  %v500_v4 = vld [vmem:[%s185_s29] sm:$0xff]  ;;  %v501_v5 = vld [vmem:[%s185_s29 + $0x8] sm:$0xff]  ;;  %v503_v7 = vld [vmem:[%s185_s29 + $0x18] sm:$0xff]  ;;  %s208_s29 = scalar_lea.vmem [#allocation5], %s458_s10  ;;  %s366_s28 = sshll.u32 %s362_s23, 4  ;;  %s367_s28 = int_to_ptr.hbm [resolvable:$true] %s366_s28 }
  0x25   : > { %v585_v8 = vld [vmem:[%s865_s2] ss:$0 sm:$0xff]  ;;  %s364_s22 = sshll.u32 %s208_s29, 4  ;;  %s630_s4 = sshra.s32 %s367_s28, 4  ;;  %s365_s22 = int_to_ptr.vmem [resolvable:$true] %s364_s22  ;;  %s631_s4 = int_to_ptr.hbm [resolvable:$true] %s630_s4 }
  0x26   : > { %s632_s5 = scalar_lea.hbm %s631_s4, 8  ;;  %s636_s24 = scalar_lea.hbm %s866_s3, 16 }
  0x27   : > { %293 = vmatpush.bf16.msra.mxu0 %v506_v1  ;;  %511 = vmatpush.bf16.msra.mxu1 %v506_v1  ;;  %p633_p4 = scmp.ne.s32.totalorder %s631_s4, %s632_s5  ;;  %p637_p7 = scmp.lt.s32.totalorder %s631_s4, %s866_s3 }
  0x28   : > { %512 = vmatpush.bf16.msra.mxu2 %v506_v1  ;;  %513 = vmatpush.bf16.msra.mxu3 %v506_v1  ;;  %p638_p8 = scmp.lt.s32.totalorder %s636_s24, %s632_s5 }
  0x29   : > { %p634_p5 = pnand %p633_p4, %p773_p9 }
  0x2a   : > { %p639_p10 = por %p638_p8, %p637_p7 }
  0x2b   : > { %294 = vmatpush.bf16.msra.mxu0 %v505_v2  ;;  %514 = vmatpush.bf16.msra.mxu1 %v505_v2  ;;  %p635_p6 = pneg %p634_p5 }
  0x2c   : > { %515 = vmatpush.bf16.msra.mxu2 %v505_v2  ;;  %516 = vmatpush.bf16.msra.mxu3 %v505_v2 }
  0x2d   : > { %p640_p13 = pnand %p639_p10, %p635_p6 }
  0x2f   : > { %295 = vmatpush.bf16.msra.mxu0 %v504_v3  ;;  %517 = vmatpush.bf16.msra.mxu1 %v504_v3 }
  0x30   : > { %518 = vmatpush.bf16.msra.mxu2 %v504_v3  ;;  %519 = vmatpush.bf16.msra.mxu3 %v504_v3 }
  0x32   : > { %491 = vmatmul.msk.bf16.vlgmr.msra.gmra.mxu0 %vm275_vm0, %v500_v4  ;;  %492 = vmatmul.msk.bf16.vlgmr.msra.gmra.mxu1 %vm275_vm0, %v501_v5 }
  0x33   : > { %493 = vmatmul.msk.bf16.vlgmr.msra.gmra.mxu2 %vm275_vm0, %v502_v6  ;;  %494 = vmatmul.msk.bf16.vlgmr.msra.gmra.mxu3 %vm275_vm0, %v503_v7 }
  0xaf   : > { %v297_v9 = vpop.f32.mrf.mxu0  ;;  %v302_v13 = vpop.f32.mrf.mxu1 }
  0xb0   : > { %v298_v10 = vadd.f32 %v585_v8, %v297_v9  ;;  %v303_v14 = vadd.f32 %v585_v8, %v302_v13 }
  0xb2   : > { %317 = vxpose.xlu0.b32.start [1/8] (short) (narrow) %v298_v10, 8 }
  0xb6   : > { %v307_v17 = vpop.f32.mrf.mxu2  ;;  %v312_v21 = vpop.f32.mrf.mxu3 }
  0xb7   : > { %v299_v11 = vpop.f32.mrf.mxu0  ;;  %v304_v15 = vpop.f32.mrf.mxu1  ;;  %v308_v18 = vadd.f32 %v585_v8, %v307_v17  ;;  %v313_v22 = vadd.f32 %v585_v8, %v312_v21 }
  0xb8   : > { %v300_v12 = vadd.f32 %v585_v8, %v299_v11  ;;  %v305_v16 = vadd.f32 %v585_v8, %v304_v15 }
  0xba   : > { %318 = vxpose.xlu0.b32.cont [2/8] (short) (narrow) %v300_v12, 8 }
  0xbe   : > { %v309_v19 = vpop.f32.mrf.mxu2  ;;  %v314_v23 = vpop.f32.mrf.mxu3 }
  0xbf   : > { %v310_v20 = vadd.f32 %v585_v8, %v309_v19  ;;  %v315_v24 = vadd.f32 %v585_v8, %v314_v23 }
  0xc2   : > { %319 = vxpose.xlu0.b32.cont [3/8] (short) (narrow) %v303_v14, 8 }
  0xca   : > { %320 = vxpose.xlu0.b32.cont [4/8] (short) (narrow) %v305_v16, 8 }
  0xd2   : > { %321 = vxpose.xlu0.b32.cont [5/8] (short) (narrow) %v308_v18, 8 }
  0xda   : > { %322 = vxpose.xlu0.b32.cont [6/8] (short) (narrow) %v310_v20, 8 }
  0xe2   : > { %323 = vxpose.xlu0.b32.cont [7/8] (short) (narrow) %v313_v22, 8 }
  0xea   : > { %324 = vxpose.xlu0.b32.end [8/8] (short) (narrow) %v315_v24, 8 }
 0x156   : > { %v333_v25 = vpop.trf.xlu0 }
 0x157   : > { %349 = vst.msk [vmem:[%s208_s29] sm:$0xff] %vm275_vm0, %v333_v25 }
 0x158   : > { %643 = shalt.err (!%p640_p13)
}
 0x159   : > { %522 = dma.vmem_to_hbm [thread:$0]  (%p773_p9), %s365_s22, 128, %s367_s28, %s351_s30  }
 0x15a PF: > { %s378_s19 = sand.u32 1, %s678_s12   ;;  %p529_p0 = pnand %p452_p12, %p780_p11 }
 0x15b   : > { %s379_s9 = scalar_lea.sflag [#allocation4], %s378_s19 }
 0x15c   : > { %p530_p1 = pneg %p529_p0 }
 0x15e   : > { %673 = dma.done.wait (%p530_p1), %s379_s9, 128  }
 0x15f   : > { %675 = vsyncadd (%p530_p1), %s379_s9, 4294967168  ;;  %s19_s17 = sadd.s32 1, %s698_s17   ;;  %s871_s12 = smov %s682_s13 }
 0x160   : > { %p16_p2 = scmp.ge.s32.totalorder %s19_s17, 4   ;;  %s872_s13 = smov %s686_s14 }
 0x161   : > { %s873_s14 = smov %s778_s26  ;;  %s874_s15 = smov %s694_s16 }
 0x162   : > { %s875_s16 = smov %s877_s20  ;;  %18 = sbr.rel (!%p16_p2) target bundleno = 6 (0x6), region = 77 }
 0x167   :  { %385 = vsyncpa [#allocation3], 1 }
 0x168   :  { %387 = vsyncpa [#allocation3 + $0x1], 1 }
 0x169   :  { %388 = vsyncpa [#allocation4], 1 }
 0x16a   :  { %390 = vsyncpa [#allocation4 + $0x1], 1 }

</bundles_post_ra>
